<compile_context>
chip_gen: v6e
topology: v6e:2x2x1
jax: 0.10.0
libtpu: 0.0.40
codegen_flags: <defaults>
</compile_context>

<pallas_src>
import functools
import math

import numpy as np

import jax
import jax.numpy as jnp
from jax.experimental import pallas as pl
from jax.experimental.pallas import tpu as pltpu


# ------------------------------ fused kernel --------------------------------

def _transformer_cell_kernel(xq_ref, key_ref, val_ref,
                             wq_ref, bq_ref, wk_ref, bk_ref, wv_ref, bv_ref,
                             abias_ref, wo_ref, bo_ref, cmask_ref,
                             gamma_ref, beta_ref, o_ref,
                             *, scale, eps, nb_pack, hw, t_steps, shifts):
    f32 = jnp.float32
    bf16 = jnp.bfloat16
    cq, nbhw = xq_ref.shape

    xq = xq_ref[...]                                                # (Cq, NB*HW) f32

    # ---- 1x1 projections: bf16 MXU operands, f32 accumulate ----
    q = jnp.dot(wq_ref[...], xq.astype(bf16),
                preferred_element_type=f32) + bq_ref[...]           # (Ci, NB*HW)
    k_parts, v_parts = [], []
    for t in range(t_steps):                                        # reuse (Ci,Ckv) weight
        k_parts.append(jnp.dot(wk_ref[...], key_ref[t],
                               preferred_element_type=f32) + bk_ref[...])
        v_parts.append(jnp.dot(wv_ref[...], val_ref[t],
                               preferred_element_type=f32) + bv_ref[...])
    k = jnp.concatenate(k_parts, axis=0)                            # (T*Ci, NB*HW) f32
    v = jnp.concatenate(v_parts, axis=0)

    q_b = q.astype(bf16)
    k_b = k.astype(bf16)
    v_b = v.astype(bf16)
    abias = abias_ref[...]                                          # (Ci, T*Ci) f32

    # ---- channel attention, per packed batch element (softmax in f32) ----
    # Cross-head score entries get -1e30 via the additive bias -> exp == 0, so
    # each row's softmax matches per-head FullAttention exactly. At heads=2 the
    # fused masked-scores matmul is cheaper than per-head blocking.
    attn_parts = []
    for nb in range(nb_pack):
        sl = slice(nb * hw, (nb + 1) * hw)
        scores = jax.lax.dot_general(q_b[:, sl], k_b[:, sl],
                                     (((1,), (1,)), ((), ())),
                                     preferred_element_type=f32)    # (Ci, T*Ci)
        scores = scores * scale + abias
        mx = jnp.max(scores, axis=-1, keepdims=True)
        e = jnp.exp(scores - mx)
        p = e * pl.reciprocal(jnp.sum(e, axis=-1, keepdims=True))
        # TODO(synk): attention_dropout(p=0.2) is a no-op in eval mode; not implemented.
        attn_parts.append(jnp.dot(p.astype(bf16), v_b[:, sl],
                                  preferred_element_type=f32))      # (Ci, HW)
    attn = attn_parts[0] if nb_pack == 1 else jnp.concatenate(attn_parts, axis=1)

    # ---- 3x3 conv, padding=1: 9 XLU rolls + boundary masks, ONE MXU matmul ----
    cmask = cmask_ref[...]                                          # (9, NB*HW) f32
    shifted = []
    for tap, s in enumerate(shifts):
        r = attn if s == 0 else pltpu.roll(attn, (-s) % nbhw, 1)
        shifted.append(r * cmask[tap:tap + 1, :])
    stack = jnp.concatenate(shifted, axis=0).astype(bf16)           # (9*Ci, NB*HW)
    conv = jnp.dot(wo_ref[...], stack,
                   preferred_element_type=f32) + bo_ref[...]        # (Cq, NB*HW)

    # ---- residual + LayerNorm over each batch element's (Cq, HW) slab ----
    s_res = xq + conv
    s_sq = s_res * s_res
    lane = jax.lax.broadcasted_iota(jnp.int32, (1, nbhw), 1)
    inv_n = 1.0 / (cq * hw)
    mu_l = jnp.zeros((1, nbhw), f32)
    rstd_l = jnp.zeros((1, nbhw), f32)
    for nb in range(nb_pack):
        m = jnp.logical_and(lane >= nb * hw, lane < (nb + 1) * hw).astype(f32)
        mu = jnp.sum(s_res * m) * inv_n
        var = jnp.sum(s_sq * m) * inv_n - mu * mu                   # one-pass stats
        rstd = jax.lax.rsqrt(var + eps)
        mu_l = mu_l + mu * m
        rstd_l = rstd_l + rstd * m
    o_ref[...] = (s_res - mu_l) * rstd_l * gamma_ref[...] + beta_ref[...]


# --------------------------- constant helpers --------------------------------

def _conv3x3_shifts_and_masks(H, W, NB):
    """Static flat-HW shifts + (9, NB*HW) 0/1 boundary masks for the 3x3 conv.

    The masks also kill wrap-around / cross-batch reads of the lane rolls."""
    HW = H * W
    p = np.arange(NB * HW)
    y = (p % HW) // W
    x = p % W
    shifts, masks = [], []
    for ky in range(3):
        for kx in range(3):
            dy, dx = ky - 1, kx - 1
            shifts.append(dy * W + dx)
            valid = (y + dy >= 0) & (y + dy < H) & (x + dx >= 0) & (x + dx < W)
            masks.append(valid.astype(np.float32))
    return tuple(shifts), jnp.asarray(np.stack(masks, axis=0))


def _head_mask_bias(heads, head_channels, T):
    """(Ci, T*Ci) additive bias: 0 for same-head (query,key) pairs, -1e30 otherwise."""
    Ci = heads * head_channels
    qh = np.arange(Ci)[:, None] // head_channels
    kh = (np.arange(T * Ci)[None, :] % Ci) // head_channels
    return jnp.asarray(np.where(qh == kh, 0.0, -1e30).astype(np.float32))


def _pick_lane_pack(B, HW):
    """How many batch elements to pack into lanes per grid step (lane density)."""
    if HW % 128 == 0 or B == 1:
        return 1
    best = 1
    for nb in range(1, B + 1):
        if B % nb:
            continue
        if (nb * HW) % 128 == 0 and nb * HW <= 1024:
            return nb
        if nb * HW <= 256:
            best = nb
    return best


# ------------------------------- forward -------------------------------------

def transformer_cell_forward(params, in_query, key, value, *, heads, head_channels):
    if isinstance(key, (list, tuple)):
        key = jnp.stack(key, axis=1)
        value = jnp.stack(value, axis=1)

    f32, bf16 = jnp.float32, jnp.bfloat16
    B, Cq, H, W = in_query.shape
    _, T, Ckv, _, _ = key.shape
    Ci = heads * head_channels
    HW = H * W
    scale = 1.0 / math.sqrt(HW)          # FullAttention default: 1/sqrt(E), E = H*W

    NB = _pick_lane_pack(B, HW)          # batch elements packed into lanes per step
    G = B // NB
    NBHW = NB * HW

    # ---- activations: pack NB batch elements side-by-side along lanes ----
    xq = (in_query.astype(f32).reshape(G, NB, Cq, HW)
          .transpose(0, 2, 1, 3).reshape(G, Cq, NBHW))
    key_p = (key.astype(bf16).reshape(G, NB, T, Ckv, HW)
             .transpose(0, 2, 3, 1, 4).reshape(G, T, Ckv, NBHW))
    val_p = (value.astype(bf16).reshape(G, NB, T, Ckv, HW)
             .transpose(0, 2, 3, 1, 4).reshape(G, T, Ckv, NBHW))

    # ---- weights (bf16 MXU operands; biases / LN params in f32) ----
    wq = params["wq"].astype(bf16)                                  # (Ci, Cq)
    wk = params["wk"].astype(bf16)                                  # (Ci, Ckv)
    wv = params["wv"].astype(bf16)
    bq = params["bq"].reshape(Ci, 1).astype(f32)
    bk = params["bk"].reshape(Ci, 1).astype(f32)
    bv = params["bv"].reshape(Ci, 1).astype(f32)

    # 3x3 conv weights: input channels permuted to the kernel's attn row order
    # (torch s_attn channel = l*heads + h; kernel attn row = h*head_channels + l),
    # then flattened tap-major to (Cq, 9*Ci) for the single fused tap matmul.
    r = np.arange(Ci)
    perm = (r % head_channels) * heads + (r // head_channels)
    wo2 = (params["wo"].astype(f32)[:, perm, :, :]
           .transpose(0, 2, 3, 1).reshape(Cq, 9 * Ci).astype(bf16))
    bo = params["bo"].reshape(Cq, 1).astype(f32)
    gamma = jnp.tile(params["gamma"].reshape(Cq, HW).astype(f32), (1, NB))
    beta = jnp.tile(params["beta"].reshape(Cq, HW).astype(f32), (1, NB))

    abias = _head_mask_bias(heads, head_channels, T)                # (Ci, T*Ci)
    shifts, cmask = _conv3x3_shifts_and_masks(H, W, NB)             # taps + masks

    kern = functools.partial(_transformer_cell_kernel, scale=scale, eps=1e-5,
                             nb_pack=NB, hw=HW, t_steps=T, shifts=shifts)

    flops = 2 * B * HW * (Ci * Cq + 2 * T * Ci * Ckv + 2 * T * Ci * Ci + 9 * Ci * Cq)
    transcendentals = B * Ci * T * Ci
    operands = (xq, key_p, val_p, wq, bq, wk, bk, wv, bv, abias, wo2, bo,
                cmask, gamma, beta)
    bytes_accessed = int(sum(np.prod(a.shape) * a.dtype.itemsize for a in operands)
                         + G * Cq * NBHW * 4)

    batched3 = lambda g: (g, 0, 0)
    batched4 = lambda g: (g, 0, 0, 0)
    const2 = lambda g: (0, 0)

    out = pl.pallas_call(
        kern,
        out_shape=jax.ShapeDtypeStruct((G, Cq, NBHW), f32),
        grid=(G,),
        in_specs=[
            pl.BlockSpec((None, Cq, NBHW), batched3),        # in_query (packed, f32)
            pl.BlockSpec((None, T, Ckv, NBHW), batched4),    # key   (packed, bf16)
            pl.BlockSpec((None, T, Ckv, NBHW), batched4),    # value (packed, bf16)
            pl.BlockSpec((Ci, Cq), const2),                  # wq
            pl.BlockSpec((Ci, 1), const2),                   # bq
            pl.BlockSpec((Ci, Ckv), const2),                 # wk
            pl.BlockSpec((Ci, 1), const2),                   # bk
            pl.BlockSpec((Ci, Ckv), const2),                 # wv
            pl.BlockSpec((Ci, 1), const2),                   # bv
            pl.BlockSpec((Ci, T * Ci), const2),              # attention head-mask bias
            pl.BlockSpec((Cq, 9 * Ci), const2),              # wo (fused 9-tap)
            pl.BlockSpec((Cq, 1), const2),                   # bo
            pl.BlockSpec((9, NBHW), const2),                 # conv boundary masks
            pl.BlockSpec((Cq, NBHW), const2),                # gamma (lane-tiled)
            pl.BlockSpec((Cq, NBHW), const2),                # beta
        ],
        out_specs=pl.BlockSpec((None, Cq, NBHW), batched3),
        compiler_params=pltpu.CompilerParams(dimension_semantics=("parallel",)),
        cost_estimate=pl.CostEstimate(flops=flops, transcendentals=transcendentals,
                                      bytes_accessed=bytes_accessed),
    )(*operands)

    return (out.reshape(G, Cq, NB, HW).transpose(0, 2, 1, 3)
            .reshape(B, Cq, H, W))


# ----------------------------- parameter init --------------------------------

def init_params(rng, qin, kvin, heads, head_channels, width):
    Ci = heads * head_channels
    ks = jax.random.split(rng, 8)

    def u(k, shape, fan_in):
        bound = 1.0 / math.sqrt(fan_in)
        return jax.random.uniform(k, shape, jnp.float32, -bound, bound)

    return {
        "wq": u(ks[0], (Ci, qin), qin),
        "bq": u(ks[1], (Ci,), qin),
        "wk": u(ks[2], (Ci, kvin), kvin),
        "bk": u(ks[3], (Ci,), kvin),
        "wv": u(ks[4], (Ci, kvin), kvin),
        "bv": u(ks[5], (Ci,), kvin),
        "wo": u(ks[6], (qin, Ci, 3, 3), Ci * 9),
        "bo": u(ks[7], (qin,), Ci * 9),
        # LayerNorm default init
        "gamma": jnp.ones((qin, width, width), jnp.float32),
        "beta": jnp.zeros((qin, width, width), jnp.float32),
    }


# --------------------------------- main ---------------------------------------

if __name__ == "__main__":
    B, T = 2, 3
    qin_channels, kvin_channels = 4, 4
    heads, head_channels = 2, 4
    width = 8

    root = jax.random.PRNGKey(0)
    k_param, k_q, k_k, k_v = jax.random.split(root, 4)

    params = init_params(k_param, qin_channels, kvin_channels,
                         heads, head_channels, width)

    in_query = jax.random.normal(k_q, (B, qin_channels, width, width), jnp.float32)
    key = jax.random.normal(k_k, (B, T, kvin_channels, width, width), jnp.float32)
    value = jax.random.normal(k_v, (B, T, kvin_channels, width, width), jnp.float32)

    fwd = jax.jit(functools.partial(transformer_cell_forward,
                                    heads=heads, head_channels=head_channels))
    out = fwd(params, in_query, key, value)
    jax.block_until_ready(out)

    assert out.shape == (B, qin_channels, width, width)
    assert bool(jnp.all(jnp.isfinite(out)))
    print("KERNEL_OK")
</pallas_src>

<mosaic_0001>
module attributes {stable_mosaic.version = 11 : i64} {
  func.func @_transformer_cell_kernel(%arg0: i32, %arg1: memref<1x4x128xf32, #tpu.memory_space<vmem>>, %arg2: memref<1x3x4x128xbf16, #tpu.memory_space<vmem>>, %arg3: memref<1x3x4x128xbf16, #tpu.memory_space<vmem>>, %arg4: memref<8x4xbf16, #tpu.memory_space<vmem>>, %arg5: memref<8x1xf32, #tpu.memory_space<vmem>>, %arg6: memref<8x4xbf16, #tpu.memory_space<vmem>>, %arg7: memref<8x1xf32, #tpu.memory_space<vmem>>, %arg8: memref<8x4xbf16, #tpu.memory_space<vmem>>, %arg9: memref<8x1xf32, #tpu.memory_space<vmem>>, %arg10: memref<8x24xf32, #tpu.memory_space<vmem>>, %arg11: memref<4x72xbf16, #tpu.memory_space<vmem>>, %arg12: memref<4x1xf32, #tpu.memory_space<vmem>>, %arg13: memref<9x128xf32, #tpu.memory_space<vmem>>, %arg14: memref<4x128xf32, #tpu.memory_space<vmem>>, %arg15: memref<4x128xf32, #tpu.memory_space<vmem>>, %arg16: memref<1x4x128xf32, #tpu.memory_space<vmem>>) attributes {dimension_semantics = [#tpu.dimension_semantics<parallel>], iteration_bounds = array<i64: 1>, scalar_prefetch = 0 : i64, scratch_operands = 0 : i64, tpu.core_type = #tpu.core_type<tc>, window_params = [{transform_indices = @transform_0, window_bounds = array<i64: 1, 4, 128>}, {transform_indices = @transform_1, window_bounds = array<i64: 1, 3, 4, 128>}, {transform_indices = @transform_2, window_bounds = array<i64: 1, 3, 4, 128>}, {pipeline_mode = #tpu.pipeline_mode<synchronous>, transform_indices = @transform_3, window_bounds = array<i64: 8, 4>}, {pipeline_mode = #tpu.pipeline_mode<synchronous>, transform_indices = @transform_4, window_bounds = array<i64: 8, 1>}, {pipeline_mode = #tpu.pipeline_mode<synchronous>, transform_indices = @transform_5, window_bounds = array<i64: 8, 4>}, {pipeline_mode = #tpu.pipeline_mode<synchronous>, transform_indices = @transform_6, window_bounds = array<i64: 8, 1>}, {pipeline_mode = #tpu.pipeline_mode<synchronous>, transform_indices = @transform_7, window_bounds = array<i64: 8, 4>}, {pipeline_mode = #tpu.pipeline_mode<synchronous>, transform_indices = @transform_8, window_bounds = array<i64: 8, 1>}, {pipeline_mode = #tpu.pipeline_mode<synchronous>, transform_indices = @transform_9, window_bounds = array<i64: 8, 24>}, {pipeline_mode = #tpu.pipeline_mode<synchronous>, transform_indices = @transform_10, window_bounds = array<i64: 4, 72>}, {pipeline_mode = #tpu.pipeline_mode<synchronous>, transform_indices = @transform_11, window_bounds = array<i64: 4, 1>}, {pipeline_mode = #tpu.pipeline_mode<synchronous>, transform_indices = @transform_12, window_bounds = array<i64: 9, 128>}, {pipeline_mode = #tpu.pipeline_mode<synchronous>, transform_indices = @transform_13, window_bounds = array<i64: 4, 128>}, {pipeline_mode = #tpu.pipeline_mode<synchronous>, transform_indices = @transform_14, window_bounds = array<i64: 4, 128>}, {transform_indices = @transform_15, window_bounds = array<i64: 1, 4, 128>}]} {
    %c0 = arith.constant 0 : index
    %c0_0 = arith.constant 0 : index
    %c0_1 = arith.constant 0 : index
    %0 = vector.load %arg1[%c0, %c0_0, %c0_1] : memref<1x4x128xf32, #tpu.memory_space<vmem>>, vector<1x4x128xf32>
    %1 = vector.shape_cast %0 : vector<1x4x128xf32> to vector<4x128xf32>
    %c0_2 = arith.constant 0 : index
    %c0_3 = arith.constant 0 : index
    %2 = vector.load %arg4[%c0_2, %c0_3] : memref<8x4xbf16, #tpu.memory_space<vmem>>, vector<8x4xbf16>
    %3 = arith.truncf %1 : vector<4x128xf32> to vector<4x128xbf16>
    %cst = arith.constant dense<0.000000e+00> : vector<8x128xf32>
    %4 = tpu.matmul %2, %3, %cst {dimension_numbers = #tpu.dot_dimension_numbers<[1], [0], [0], [1], [0, 0, 1, 1], [], []>} : vector<8x4xbf16>, vector<4x128xbf16>, vector<8x128xf32> -> vector<8x128xf32>
    %c0_4 = arith.constant 0 : index
    %c0_5 = arith.constant 0 : index
    %5 = vector.load %arg5[%c0_4, %c0_5] : memref<8x1xf32, #tpu.memory_space<vmem>>, vector<8x1xf32>
    %6 = vector.broadcast %5 : vector<8x1xf32> to vector<8x128xf32>
    %7 = arith.addf %4, %6 : vector<8x128xf32>
    %c0_6 = arith.constant 0 : index
    %c0_7 = arith.constant 0 : index
    %8 = vector.load %arg6[%c0_6, %c0_7] : memref<8x4xbf16, #tpu.memory_space<vmem>>, vector<8x4xbf16>
    %c0_8 = arith.constant 0 : index
    %c0_9 = arith.constant 0 : index
    %c0_10 = arith.constant 0 : index
    %c0_11 = arith.constant 0 : index
    %9 = vector.load %arg2[%c0_8, %c0_9, %c0_10, %c0_11] : memref<1x3x4x128xbf16, #tpu.memory_space<vmem>>, vector<1x1x4x128xbf16>
    %10 = vector.shape_cast %9 : vector<1x1x4x128xbf16> to vector<4x128xbf16>
    %cst_12 = arith.constant dense<0.000000e+00> : vector<8x128xf32>
    %11 = tpu.matmul %8, %10, %cst_12 {dimension_numbers = #tpu.dot_dimension_numbers<[1], [0], [0], [1], [0, 0, 1, 1], [], []>} : vector<8x4xbf16>, vector<4x128xbf16>, vector<8x128xf32> -> vector<8x128xf32>
    %c0_13 = arith.constant 0 : index
    %c0_14 = arith.constant 0 : index
    %12 = vector.load %arg7[%c0_13, %c0_14] : memref<8x1xf32, #tpu.memory_space<vmem>>, vector<8x1xf32>
    %13 = vector.broadcast %12 : vector<8x1xf32> to vector<8x128xf32>
    %14 = arith.addf %11, %13 : vector<8x128xf32>
    %c0_15 = arith.constant 0 : index
    %c0_16 = arith.constant 0 : index
    %15 = vector.load %arg8[%c0_15, %c0_16] : memref<8x4xbf16, #tpu.memory_space<vmem>>, vector<8x4xbf16>
    %c0_17 = arith.constant 0 : index
    %c0_18 = arith.constant 0 : index
    %c0_19 = arith.constant 0 : index
    %c0_20 = arith.constant 0 : index
    %16 = vector.load %arg3[%c0_17, %c0_18, %c0_19, %c0_20] : memref<1x3x4x128xbf16, #tpu.memory_space<vmem>>, vector<1x1x4x128xbf16>
    %17 = vector.shape_cast %16 : vector<1x1x4x128xbf16> to vector<4x128xbf16>
    %cst_21 = arith.constant dense<0.000000e+00> : vector<8x128xf32>
    %18 = tpu.matmul %15, %17, %cst_21 {dimension_numbers = #tpu.dot_dimension_numbers<[1], [0], [0], [1], [0, 0, 1, 1], [], []>} : vector<8x4xbf16>, vector<4x128xbf16>, vector<8x128xf32> -> vector<8x128xf32>
    %c0_22 = arith.constant 0 : index
    %c0_23 = arith.constant 0 : index
    %19 = vector.load %arg9[%c0_22, %c0_23] : memref<8x1xf32, #tpu.memory_space<vmem>>, vector<8x1xf32>
    %20 = vector.broadcast %19 : vector<8x1xf32> to vector<8x128xf32>
    %21 = arith.addf %18, %20 : vector<8x128xf32>
    %c0_24 = arith.constant 0 : index
    %c0_25 = arith.constant 0 : index
    %22 = vector.load %arg6[%c0_24, %c0_25] : memref<8x4xbf16, #tpu.memory_space<vmem>>, vector<8x4xbf16>
    %c0_26 = arith.constant 0 : index
    %c1 = arith.constant 1 : index
    %c0_27 = arith.constant 0 : index
    %c0_28 = arith.constant 0 : index
    %23 = vector.load %arg2[%c0_26, %c1, %c0_27, %c0_28] : memref<1x3x4x128xbf16, #tpu.memory_space<vmem>>, vector<1x1x4x128xbf16>
    %24 = vector.shape_cast %23 : vector<1x1x4x128xbf16> to vector<4x128xbf16>
    %cst_29 = arith.constant dense<0.000000e+00> : vector<8x128xf32>
    %25 = tpu.matmul %22, %24, %cst_29 {dimension_numbers = #tpu.dot_dimension_numbers<[1], [0], [0], [1], [0, 0, 1, 1], [], []>} : vector<8x4xbf16>, vector<4x128xbf16>, vector<8x128xf32> -> vector<8x128xf32>
    %c0_30 = arith.constant 0 : index
    %c0_31 = arith.constant 0 : index
    %26 = vector.load %arg7[%c0_30, %c0_31] : memref<8x1xf32, #tpu.memory_space<vmem>>, vector<8x1xf32>
    %27 = vector.broadcast %26 : vector<8x1xf32> to vector<8x128xf32>
    %28 = arith.addf %25, %27 : vector<8x128xf32>
    %c0_32 = arith.constant 0 : index
    %c0_33 = arith.constant 0 : index
    %29 = vector.load %arg8[%c0_32, %c0_33] : memref<8x4xbf16, #tpu.memory_space<vmem>>, vector<8x4xbf16>
    %c0_34 = arith.constant 0 : index
    %c1_35 = arith.constant 1 : index
    %c0_36 = arith.constant 0 : index
    %c0_37 = arith.constant 0 : index
    %30 = vector.load %arg3[%c0_34, %c1_35, %c0_36, %c0_37] : memref<1x3x4x128xbf16, #tpu.memory_space<vmem>>, vector<1x1x4x128xbf16>
    %31 = vector.shape_cast %30 : vector<1x1x4x128xbf16> to vector<4x128xbf16>
    %cst_38 = arith.constant dense<0.000000e+00> : vector<8x128xf32>
    %32 = tpu.matmul %29, %31, %cst_38 {dimension_numbers = #tpu.dot_dimension_numbers<[1], [0], [0], [1], [0, 0, 1, 1], [], []>} : vector<8x4xbf16>, vector<4x128xbf16>, vector<8x128xf32> -> vector<8x128xf32>
    %c0_39 = arith.constant 0 : index
    %c0_40 = arith.constant 0 : index
    %33 = vector.load %arg9[%c0_39, %c0_40] : memref<8x1xf32, #tpu.memory_space<vmem>>, vector<8x1xf32>
    %34 = vector.broadcast %33 : vector<8x1xf32> to vector<8x128xf32>
    %35 = arith.addf %32, %34 : vector<8x128xf32>
    %c0_41 = arith.constant 0 : index
    %c0_42 = arith.constant 0 : index
    %36 = vector.load %arg6[%c0_41, %c0_42] : memref<8x4xbf16, #tpu.memory_space<vmem>>, vector<8x4xbf16>
    %c0_43 = arith.constant 0 : index
    %c2 = arith.constant 2 : index
    %c0_44 = arith.constant 0 : index
    %c0_45 = arith.constant 0 : index
    %37 = vector.load %arg2[%c0_43, %c2, %c0_44, %c0_45] : memref<1x3x4x128xbf16, #tpu.memory_space<vmem>>, vector<1x1x4x128xbf16>
    %38 = vector.shape_cast %37 : vector<1x1x4x128xbf16> to vector<4x128xbf16>
    %cst_46 = arith.constant dense<0.000000e+00> : vector<8x128xf32>
    %39 = tpu.matmul %36, %38, %cst_46 {dimension_numbers = #tpu.dot_dimension_numbers<[1], [0], [0], [1], [0, 0, 1, 1], [], []>} : vector<8x4xbf16>, vector<4x128xbf16>, vector<8x128xf32> -> vector<8x128xf32>
    %c0_47 = arith.constant 0 : index
    %c0_48 = arith.constant 0 : index
    %40 = vector.load %arg7[%c0_47, %c0_48] : memref<8x1xf32, #tpu.memory_space<vmem>>, vector<8x1xf32>
    %41 = vector.broadcast %40 : vector<8x1xf32> to vector<8x128xf32>
    %42 = arith.addf %39, %41 : vector<8x128xf32>
    %c0_49 = arith.constant 0 : index
    %c0_50 = arith.constant 0 : index
    %43 = vector.load %arg8[%c0_49, %c0_50] : memref<8x4xbf16, #tpu.memory_space<vmem>>, vector<8x4xbf16>
    %c0_51 = arith.constant 0 : index
    %c2_52 = arith.constant 2 : index
    %c0_53 = arith.constant 0 : index
    %c0_54 = arith.constant 0 : index
    %44 = vector.load %arg3[%c0_51, %c2_52, %c0_53, %c0_54] : memref<1x3x4x128xbf16, #tpu.memory_space<vmem>>, vector<1x1x4x128xbf16>
    %45 = vector.shape_cast %44 : vector<1x1x4x128xbf16> to vector<4x128xbf16>
    %cst_55 = arith.constant dense<0.000000e+00> : vector<8x128xf32>
    %46 = tpu.matmul %43, %45, %cst_55 {dimension_numbers = #tpu.dot_dimension_numbers<[1], [0], [0], [1], [0, 0, 1, 1], [], []>} : vector<8x4xbf16>, vector<4x128xbf16>, vector<8x128xf32> -> vector<8x128xf32>
    %c0_56 = arith.constant 0 : index
    %c0_57 = arith.constant 0 : index
    %47 = vector.load %arg9[%c0_56, %c0_57] : memref<8x1xf32, #tpu.memory_space<vmem>>, vector<8x1xf32>
    %48 = vector.broadcast %47 : vector<8x1xf32> to vector<8x128xf32>
    %49 = arith.addf %46, %48 : vector<8x128xf32>
    %50 = tpu.concatenate %14, %28, %42 in 0 : vector<8x128xf32>, vector<8x128xf32>, vector<8x128xf32> -> vector<24x128xf32>
    %51 = tpu.concatenate %21, %35, %49 in 0 : vector<8x128xf32>, vector<8x128xf32>, vector<8x128xf32> -> vector<24x128xf32>
    %52 = arith.truncf %7 : vector<8x128xf32> to vector<8x128xbf16>
    %53 = arith.truncf %50 : vector<24x128xf32> to vector<24x128xbf16>
    %54 = arith.truncf %51 : vector<24x128xf32> to vector<24x128xbf16>
    %c0_58 = arith.constant 0 : index
    %c0_59 = arith.constant 0 : index
    %55 = vector.load %arg10[%c0_58, %c0_59] : memref<8x24xf32, #tpu.memory_space<vmem>>, vector<8x24xf32>
    %56 = vector.extract_strided_slice %52 {offsets = [0, 0], sizes = [8, 64], strides = [1, 1]} : vector<8x128xbf16> to vector<8x64xbf16>
    %57 = vector.extract_strided_slice %53 {offsets = [0, 0], sizes = [24, 64], strides = [1, 1]} : vector<24x128xbf16> to vector<24x64xbf16>
    %cst_60 = arith.constant dense<0.000000e+00> : vector<8x24xf32>
    %58 = tpu.matmul %56, %57, %cst_60 {dimension_numbers = #tpu.dot_dimension_numbers<[1], [1], [0], [0], [0, 0, 1, 0], [], []>} : vector<8x64xbf16>, vector<24x64xbf16>, vector<8x24xf32> -> vector<8x24xf32>
    %cst_61 = arith.constant 1.250000e-01 : f32
    %59 = vector.broadcast %cst_61 : f32 to vector<8x24xf32>
    %60 = arith.mulf %58, %59 : vector<8x24xf32>
    %61 = arith.addf %60, %55 : vector<8x24xf32>
    %cst_62 = arith.constant dense<0xFF800000> : vector<8xf32>
    %62 = vector.multi_reduction <maximumf>, %61, %cst_62 [1] : vector<8x24xf32> to vector<8xf32>
    %63 = vector.shape_cast %62 : vector<8xf32> to vector<8x1xf32>
    %64 = vector.broadcast %63 : vector<8x1xf32> to vector<8x24xf32>
    %65 = arith.subf %61, %64 : vector<8x24xf32>
    %66 = math.exp %65 : vector<8x24xf32>
    %cst_63 = arith.constant dense<0.000000e+00> : vector<8xf32>
    %67 = vector.multi_reduction <add>, %66, %cst_63 [1] : vector<8x24xf32> to vector<8xf32>
    %68 = vector.shape_cast %67 : vector<8xf32> to vector<8x1xf32>
    %69 = tpu.reciprocal %68 : vector<8x1xf32> -> vector<8x1xf32>
    %70 = vector.broadcast %69 : vector<8x1xf32> to vector<8x24xf32>
    %71 = arith.mulf %66, %70 : vector<8x24xf32>
    %72 = arith.truncf %71 : vector<8x24xf32> to vector<8x24xbf16>
    %73 = vector.extract_strided_slice %54 {offsets = [0, 0], sizes = [24, 64], strides = [1, 1]} : vector<24x128xbf16> to vector<24x64xbf16>
    %cst_64 = arith.constant dense<0.000000e+00> : vector<8x64xf32>
    %74 = tpu.matmul %72, %73, %cst_64 {dimension_numbers = #tpu.dot_dimension_numbers<[1], [0], [0], [1], [0, 0, 1, 1], [], []>} : vector<8x24xbf16>, vector<24x64xbf16>, vector<8x64xf32> -> vector<8x64xf32>
    %75 = vector.extract_strided_slice %52 {offsets = [0, 64], sizes = [8, 64], strides = [1, 1]} : vector<8x128xbf16> to vector<8x64xbf16>
    %76 = vector.extract_strided_slice %53 {offsets = [0, 64], sizes = [24, 64], strides = [1, 1]} : vector<24x128xbf16> to vector<24x64xbf16>
    %cst_65 = arith.constant dense<0.000000e+00> : vector<8x24xf32>
    %77 = tpu.matmul %75, %76, %cst_65 {dimension_numbers = #tpu.dot_dimension_numbers<[1], [1], [0], [0], [0, 0, 1, 0], [], []>} : vector<8x64xbf16>, vector<24x64xbf16>, vector<8x24xf32> -> vector<8x24xf32>
    %cst_66 = arith.constant 1.250000e-01 : f32
    %78 = vector.broadcast %cst_66 : f32 to vector<8x24xf32>
    %79 = arith.mulf %77, %78 : vector<8x24xf32>
    %80 = arith.addf %79, %55 : vector<8x24xf32>
    %cst_67 = arith.constant dense<0xFF800000> : vector<8xf32>
    %81 = vector.multi_reduction <maximumf>, %80, %cst_67 [1] : vector<8x24xf32> to vector<8xf32>
    %82 = vector.shape_cast %81 : vector<8xf32> to vector<8x1xf32>
    %83 = vector.broadcast %82 : vector<8x1xf32> to vector<8x24xf32>
    %84 = arith.subf %80, %83 : vector<8x24xf32>
    %85 = math.exp %84 : vector<8x24xf32>
    %cst_68 = arith.constant dense<0.000000e+00> : vector<8xf32>
    %86 = vector.multi_reduction <add>, %85, %cst_68 [1] : vector<8x24xf32> to vector<8xf32>
    %87 = vector.shape_cast %86 : vector<8xf32> to vector<8x1xf32>
    %88 = tpu.reciprocal %87 : vector<8x1xf32> -> vector<8x1xf32>
    %89 = vector.broadcast %88 : vector<8x1xf32> to vector<8x24xf32>
    %90 = arith.mulf %85, %89 : vector<8x24xf32>
    %91 = arith.truncf %90 : vector<8x24xf32> to vector<8x24xbf16>
    %92 = vector.extract_strided_slice %54 {offsets = [0, 64], sizes = [24, 64], strides = [1, 1]} : vector<24x128xbf16> to vector<24x64xbf16>
    %cst_69 = arith.constant dense<0.000000e+00> : vector<8x64xf32>
    %93 = tpu.matmul %91, %92, %cst_69 {dimension_numbers = #tpu.dot_dimension_numbers<[1], [0], [0], [1], [0, 0, 1, 1], [], []>} : vector<8x24xbf16>, vector<24x64xbf16>, vector<8x64xf32> -> vector<8x64xf32>
    %94 = tpu.concatenate %74, %93 in 1 : vector<8x64xf32>, vector<8x64xf32> -> vector<8x128xf32>
    %c0_70 = arith.constant 0 : index
    %c0_71 = arith.constant 0 : index
    %95 = vector.load %arg13[%c0_70, %c0_71] : memref<9x128xf32, #tpu.memory_space<vmem>>, vector<9x128xf32>
    %c9_i32 = arith.constant 9 : i32
    %96 = tpu.dynamic_rotate %94 by %c9_i32 dim 1 : vector<8x128xf32>, i32 -> vector<8x128xf32>
    %97 = vector.extract_strided_slice %95 {offsets = [0, 0], sizes = [1, 128], strides = [1, 1]} : vector<9x128xf32> to vector<1x128xf32>
    %98 = vector.broadcast %97 : vector<1x128xf32> to vector<8x128xf32>
    %99 = arith.mulf %96, %98 : vector<8x128xf32>
    %c8_i32 = arith.constant 8 : i32
    %100 = tpu.dynamic_rotate %94 by %c8_i32 dim 1 : vector<8x128xf32>, i32 -> vector<8x128xf32>
    %101 = vector.extract_strided_slice %95 {offsets = [1, 0], sizes = [1, 128], strides = [1, 1]} : vector<9x128xf32> to vector<1x128xf32>
    %102 = vector.broadcast %101 : vector<1x128xf32> to vector<8x128xf32>
    %103 = arith.mulf %100, %102 : vector<8x128xf32>
    %c7_i32 = arith.constant 7 : i32
    %104 = tpu.dynamic_rotate %94 by %c7_i32 dim 1 : vector<8x128xf32>, i32 -> vector<8x128xf32>
    %105 = vector.extract_strided_slice %95 {offsets = [2, 0], sizes = [1, 128], strides = [1, 1]} : vector<9x128xf32> to vector<1x128xf32>
    %106 = vector.broadcast %105 : vector<1x128xf32> to vector<8x128xf32>
    %107 = arith.mulf %104, %106 : vector<8x128xf32>
    %c1_i32 = arith.constant 1 : i32
    %108 = tpu.dynamic_rotate %94 by %c1_i32 dim 1 : vector<8x128xf32>, i32 -> vector<8x128xf32>
    %109 = vector.extract_strided_slice %95 {offsets = [3, 0], sizes = [1, 128], strides = [1, 1]} : vector<9x128xf32> to vector<1x128xf32>
    %110 = vector.broadcast %109 : vector<1x128xf32> to vector<8x128xf32>
    %111 = arith.mulf %108, %110 : vector<8x128xf32>
    %112 = vector.extract_strided_slice %95 {offsets = [4, 0], sizes = [1, 128], strides = [1, 1]} : vector<9x128xf32> to vector<1x128xf32>
    %113 = vector.broadcast %112 : vector<1x128xf32> to vector<8x128xf32>
    %114 = arith.mulf %94, %113 : vector<8x128xf32>
    %c127_i32 = arith.constant 127 : i32
    %115 = tpu.dynamic_rotate %94 by %c127_i32 dim 1 : vector<8x128xf32>, i32 -> vector<8x128xf32>
    %116 = vector.extract_strided_slice %95 {offsets = [5, 0], sizes = [1, 128], strides = [1, 1]} : vector<9x128xf32> to vector<1x128xf32>
    %117 = vector.broadcast %116 : vector<1x128xf32> to vector<8x128xf32>
    %118 = arith.mulf %115, %117 : vector<8x128xf32>
    %c121_i32 = arith.constant 121 : i32
    %119 = tpu.dynamic_rotate %94 by %c121_i32 dim 1 : vector<8x128xf32>, i32 -> vector<8x128xf32>
    %120 = vector.extract_strided_slice %95 {offsets = [6, 0], sizes = [1, 128], strides = [1, 1]} : vector<9x128xf32> to vector<1x128xf32>
    %121 = vector.broadcast %120 : vector<1x128xf32> to vector<8x128xf32>
    %122 = arith.mulf %119, %121 : vector<8x128xf32>
    %c120_i32 = arith.constant 120 : i32
    %123 = tpu.dynamic_rotate %94 by %c120_i32 dim 1 : vector<8x128xf32>, i32 -> vector<8x128xf32>
    %124 = vector.extract_strided_slice %95 {offsets = [7, 0], sizes = [1, 128], strides = [1, 1]} : vector<9x128xf32> to vector<1x128xf32>
    %125 = vector.broadcast %124 : vector<1x128xf32> to vector<8x128xf32>
    %126 = arith.mulf %123, %125 : vector<8x128xf32>
    %c119_i32 = arith.constant 119 : i32
    %127 = tpu.dynamic_rotate %94 by %c119_i32 dim 1 : vector<8x128xf32>, i32 -> vector<8x128xf32>
    %128 = vector.extract_strided_slice %95 {offsets = [8, 0], sizes = [1, 128], strides = [1, 1]} : vector<9x128xf32> to vector<1x128xf32>
    %129 = vector.broadcast %128 : vector<1x128xf32> to vector<8x128xf32>
    %130 = arith.mulf %127, %129 : vector<8x128xf32>
    %131 = tpu.concatenate %99, %103, %107, %111, %114, %118, %122, %126, %130 in 0 : vector<8x128xf32>, vector<8x128xf32>, vector<8x128xf32>, vector<8x128xf32>, vector<8x128xf32>, vector<8x128xf32>, vector<8x128xf32>, vector<8x128xf32>, vector<8x128xf32> -> vector<72x128xf32>
    %132 = arith.truncf %131 : vector<72x128xf32> to vector<72x128xbf16>
    %c0_72 = arith.constant 0 : index
    %c0_73 = arith.constant 0 : index
    %133 = vector.load %arg11[%c0_72, %c0_73] : memref<4x72xbf16, #tpu.memory_space<vmem>>, vector<4x72xbf16>
    %cst_74 = arith.constant dense<0.000000e+00> : vector<4x128xf32>
    %134 = tpu.matmul %133, %132, %cst_74 {dimension_numbers = #tpu.dot_dimension_numbers<[1], [0], [0], [1], [0, 0, 1, 1], [], []>} : vector<4x72xbf16>, vector<72x128xbf16>, vector<4x128xf32> -> vector<4x128xf32>
    %c0_75 = arith.constant 0 : index
    %c0_76 = arith.constant 0 : index
    %135 = vector.load %arg12[%c0_75, %c0_76] : memref<4x1xf32, #tpu.memory_space<vmem>>, vector<4x1xf32>
    %136 = vector.broadcast %135 : vector<4x1xf32> to vector<4x128xf32>
    %137 = arith.addf %134, %136 : vector<4x128xf32>
    %138 = arith.addf %1, %137 : vector<4x128xf32>
    %139 = arith.mulf %138, %138 : vector<4x128xf32>
    %140 = tpu.iota {dimensions = array<i32: 1>} : vector<1x128xi32>
    %cst_77 = arith.constant 0.000000e+00 : f32
    %141 = vector.broadcast %cst_77 : f32 to vector<1x128xf32>
    %cst_78 = arith.constant 0.000000e+00 : f32
    %142 = vector.broadcast %cst_78 : f32 to vector<1x128xf32>
    %c0_i32 = arith.constant 0 : i32
    %143 = vector.broadcast %c0_i32 : i32 to vector<1x128xi32>
    %144 = arith.cmpi sge, %140, %143 : vector<1x128xi32>
    %c64_i32 = arith.constant 64 : i32
    %145 = vector.broadcast %c64_i32 : i32 to vector<1x128xi32>
    %146 = arith.cmpi slt, %140, %145 : vector<1x128xi32>
    %147 = arith.andi %144, %146 : vector<1x128xi1>
    %148 = arith.extui %147 : vector<1x128xi1> to vector<1x128xi32>
    %149 = arith.sitofp %148 : vector<1x128xi32> to vector<1x128xf32>
    %150 = vector.broadcast %149 : vector<1x128xf32> to vector<4x128xf32>
    %151 = arith.mulf %138, %150 : vector<4x128xf32>
    %152 = vector.shape_cast %151 : vector<4x128xf32> to vector<1x4x128xf32>
    %cst_79 = arith.constant dense<0.000000e+00> : vector<1xf32>
    %153 = vector.multi_reduction <add>, %152, %cst_79 [1, 2] : vector<1x4x128xf32> to vector<1xf32>
    %154 = vector.shape_cast %153 : vector<1xf32> to vector<1x1x1xf32>
    %155 = vector.extract %154[0, 0, 0] : f32 from vector<1x1x1xf32>
    %cst_80 = arith.constant 3.906250e-03 : f32
    %156 = arith.mulf %155, %cst_80 : f32
    %157 = vector.broadcast %149 : vector<1x128xf32> to vector<4x128xf32>
    %158 = arith.mulf %139, %157 : vector<4x128xf32>
    %159 = vector.shape_cast %158 : vector<4x128xf32> to vector<1x4x128xf32>
    %cst_81 = arith.constant dense<0.000000e+00> : vector<1xf32>
    %160 = vector.multi_reduction <add>, %159, %cst_81 [1, 2] : vector<1x4x128xf32> to vector<1xf32>
    %161 = vector.shape_cast %160 : vector<1xf32> to vector<1x1x1xf32>
    %162 = vector.extract %161[0, 0, 0] : f32 from vector<1x1x1xf32>
    %cst_82 = arith.constant 3.906250e-03 : f32
    %163 = arith.mulf %162, %cst_82 : f32
    %164 = arith.mulf %156, %156 : f32
    %165 = arith.subf %163, %164 : f32
    %cst_83 = arith.constant 9.99999974E-6 : f32
    %166 = arith.addf %165, %cst_83 : f32
    %167 = math.rsqrt %166 : f32
    %168 = vector.broadcast %156 : f32 to vector<1x128xf32>
    %169 = arith.mulf %168, %149 : vector<1x128xf32>
    %170 = arith.addf %141, %169 : vector<1x128xf32>
    %171 = vector.broadcast %167 : f32 to vector<1x128xf32>
    %172 = arith.mulf %171, %149 : vector<1x128xf32>
    %173 = arith.addf %142, %172 : vector<1x128xf32>
    %c64_i32_84 = arith.constant 64 : i32
    %174 = vector.broadcast %c64_i32_84 : i32 to vector<1x128xi32>
    %175 = arith.cmpi sge, %140, %174 : vector<1x128xi32>
    %c128_i32 = arith.constant 128 : i32
    %176 = vector.broadcast %c128_i32 : i32 to vector<1x128xi32>
    %177 = arith.cmpi slt, %140, %176 : vector<1x128xi32>
    %178 = arith.andi %175, %177 : vector<1x128xi1>
    %179 = arith.extui %178 : vector<1x128xi1> to vector<1x128xi32>
    %180 = arith.sitofp %179 : vector<1x128xi32> to vector<1x128xf32>
    %181 = vector.broadcast %180 : vector<1x128xf32> to vector<4x128xf32>
    %182 = arith.mulf %138, %181 : vector<4x128xf32>
    %183 = vector.shape_cast %182 : vector<4x128xf32> to vector<1x4x128xf32>
    %cst_85 = arith.constant dense<0.000000e+00> : vector<1xf32>
    %184 = vector.multi_reduction <add>, %183, %cst_85 [1, 2] : vector<1x4x128xf32> to vector<1xf32>
    %185 = vector.shape_cast %184 : vector<1xf32> to vector<1x1x1xf32>
    %186 = vector.extract %185[0, 0, 0] : f32 from vector<1x1x1xf32>
    %cst_86 = arith.constant 3.906250e-03 : f32
    %187 = arith.mulf %186, %cst_86 : f32
    %188 = vector.broadcast %180 : vector<1x128xf32> to vector<4x128xf32>
    %189 = arith.mulf %139, %188 : vector<4x128xf32>
    %190 = vector.shape_cast %189 : vector<4x128xf32> to vector<1x4x128xf32>
    %cst_87 = arith.constant dense<0.000000e+00> : vector<1xf32>
    %191 = vector.multi_reduction <add>, %190, %cst_87 [1, 2] : vector<1x4x128xf32> to vector<1xf32>
    %192 = vector.shape_cast %191 : vector<1xf32> to vector<1x1x1xf32>
    %193 = vector.extract %192[0, 0, 0] : f32 from vector<1x1x1xf32>
    %cst_88 = arith.constant 3.906250e-03 : f32
    %194 = arith.mulf %193, %cst_88 : f32
    %195 = arith.mulf %187, %187 : f32
    %196 = arith.subf %194, %195 : f32
    %cst_89 = arith.constant 9.99999974E-6 : f32
    %197 = arith.addf %196, %cst_89 : f32
    %198 = math.rsqrt %197 : f32
    %199 = vector.broadcast %187 : f32 to vector<1x128xf32>
    %200 = arith.mulf %199, %180 : vector<1x128xf32>
    %201 = arith.addf %170, %200 : vector<1x128xf32>
    %202 = vector.broadcast %198 : f32 to vector<1x128xf32>
    %203 = arith.mulf %202, %180 : vector<1x128xf32>
    %204 = arith.addf %173, %203 : vector<1x128xf32>
    %205 = vector.broadcast %201 : vector<1x128xf32> to vector<4x128xf32>
    %206 = arith.subf %138, %205 : vector<4x128xf32>
    %207 = vector.broadcast %204 : vector<1x128xf32> to vector<4x128xf32>
    %208 = arith.mulf %206, %207 : vector<4x128xf32>
    %c0_90 = arith.constant 0 : index
    %c0_91 = arith.constant 0 : index
    %209 = vector.load %arg14[%c0_90, %c0_91] : memref<4x128xf32, #tpu.memory_space<vmem>>, vector<4x128xf32>
    %210 = arith.mulf %208, %209 : vector<4x128xf32>
    %c0_92 = arith.constant 0 : index
    %c0_93 = arith.constant 0 : index
    %211 = vector.load %arg15[%c0_92, %c0_93] : memref<4x128xf32, #tpu.memory_space<vmem>>, vector<4x128xf32>
    %212 = arith.addf %210, %211 : vector<4x128xf32>
    %c0_94 = arith.constant 0 : index
    %c0_95 = arith.constant 0 : index
    %c0_96 = arith.constant 0 : index
    %213 = vector.load %arg16[%c0_94, %c0_95, %c0_96] : memref<1x4x128xf32, #tpu.memory_space<vmem>>, vector<1x4x128xf32>
    %214 = vector.shape_cast %213 : vector<1x4x128xf32> to vector<4x128xf32>
    %215 = vector.shape_cast %212 : vector<4x128xf32> to vector<1x4x128xf32>
    tpu.vector_store %arg16[%c0_94, %c0_95, %c0_96], %215 {strides = array<i32>} : memref<1x4x128xf32, #tpu.memory_space<vmem>>, vector<1x4x128xf32>,
    return
  }
  func.func @transform_0(%arg0: i32) -> (i32, i32, i32) {
    %c0_i32 = arith.constant 0 : i32
    %c0_i32_0 = arith.constant 0 : i32
    %c0_i32_1 = arith.constant 0 : i32
    return %arg0, %c0_i32, %c0_i32_0 : i32, i32, i32
  }
  func.func @transform_1(%arg0: i32) -> (i32, i32, i32, i32) {
    %c0_i32 = arith.constant 0 : i32
    %c0_i32_0 = arith.constant 0 : i32
    %c0_i32_1 = arith.constant 0 : i32
    %c0_i32_2 = arith.constant 0 : i32
    return %arg0, %c0_i32, %c0_i32_0, %c0_i32_1 : i32, i32, i32, i32
  }
  func.func @transform_2(%arg0: i32) -> (i32, i32, i32, i32) {
    %c0_i32 = arith.constant 0 : i32
    %c0_i32_0 = arith.constant 0 : i32
    %c0_i32_1 = arith.constant 0 : i32
    %c0_i32_2 = arith.constant 0 : i32
    return %arg0, %c0_i32, %c0_i32_0, %c0_i32_1 : i32, i32, i32, i32
  }
  func.func @transform_3(%arg0: i32) -> (i32, i32) {
    %c0_i32 = arith.constant 0 : i32
    %c0_i32_0 = arith.constant 0 : i32
    %c0_i32_1 = arith.constant 0 : i32
    return %c0_i32, %c0_i32_0 : i32, i32
  }
  func.func @transform_4(%arg0: i32) -> (i32, i32) {
    %c0_i32 = arith.constant 0 : i32
    %c0_i32_0 = arith.constant 0 : i32
    %c0_i32_1 = arith.constant 0 : i32
    return %c0_i32, %c0_i32_0 : i32, i32
  }
  func.func @transform_5(%arg0: i32) -> (i32, i32) {
    %c0_i32 = arith.constant 0 : i32
    %c0_i32_0 = arith.constant 0 : i32
    %c0_i32_1 = arith.constant 0 : i32
    return %c0_i32, %c0_i32_0 : i32, i32
  }
  func.func @transform_6(%arg0: i32) -> (i32, i32) {
    %c0_i32 = arith.constant 0 : i32
    %c0_i32_0 = arith.constant 0 : i32
    %c0_i32_1 = arith.constant 0 : i32
    return %c0_i32, %c0_i32_0 : i32, i32
  }
  func.func @transform_7(%arg0: i32) -> (i32, i32) {
    %c0_i32 = arith.constant 0 : i32
    %c0_i32_0 = arith.constant 0 : i32
    %c0_i32_1 = arith.constant 0 : i32
    return %c0_i32, %c0_i32_0 : i32, i32
  }
  func.func @transform_8(%arg0: i32) -> (i32, i32) {
    %c0_i32 = arith.constant 0 : i32
    %c0_i32_0 = arith.constant 0 : i32
    %c0_i32_1 = arith.constant 0 : i32
    return %c0_i32, %c0_i32_0 : i32, i32
  }
  func.func @transform_9(%arg0: i32) -> (i32, i32) {
    %c0_i32 = arith.constant 0 : i32
    %c0_i32_0 = arith.constant 0 : i32
    %c0_i32_1 = arith.constant 0 : i32
    return %c0_i32, %c0_i32_0 : i32, i32
  }
  func.func @transform_10(%arg0: i32) -> (i32, i32) {
    %c0_i32 = arith.constant 0 : i32
    %c0_i32_0 = arith.constant 0 : i32
    %c0_i32_1 = arith.constant 0 : i32
    return %c0_i32, %c0_i32_0 : i32, i32
  }
  func.func @transform_11(%arg0: i32) -> (i32, i32) {
    %c0_i32 = arith.constant 0 : i32
    %c0_i32_0 = arith.constant 0 : i32
    %c0_i32_1 = arith.constant 0 : i32
    return %c0_i32, %c0_i32_0 : i32, i32
  }
  func.func @transform_12(%arg0: i32) -> (i32, i32) {
    %c0_i32 = arith.constant 0 : i32
    %c0_i32_0 = arith.constant 0 : i32
    %c0_i32_1 = arith.constant 0 : i32
    return %c0_i32, %c0_i32_0 : i32, i32
  }
  func.func @transform_13(%arg0: i32) -> (i32, i32) {
    %c0_i32 = arith.constant 0 : i32
    %c0_i32_0 = arith.constant 0 : i32
    %c0_i32_1 = arith.constant 0 : i32
    return %c0_i32, %c0_i32_0 : i32, i32
  }
  func.func @transform_14(%arg0: i32) -> (i32, i32) {
    %c0_i32 = arith.constant 0 : i32
    %c0_i32_0 = arith.constant 0 : i32
    %c0_i32_1 = arith.constant 0 : i32
    return %c0_i32, %c0_i32_0 : i32, i32
  }
  func.func @transform_15(%arg0: i32) -> (i32, i32, i32) {
    %c0_i32 = arith.constant 0 : i32
    %c0_i32_0 = arith.constant 0 : i32
    %c0_i32_1 = arith.constant 0 : i32
    return %arg0, %c0_i32, %c0_i32_0 : i32, i32, i32
  }
}

</mosaic_0001>

<bundles_post_ra>
// kernel: tile.11
= control target key start
LH: loop header
LB: loop body
LE: loop exit
PB: predicated region body
PF: predicated region fallthrough
CT: control target
= control target key end

     0   :  { %vm22_vm0 = vcmask 523264   ;;  %vm28_vm1 = vcmask 1048064   ;;  %s70_s0 = inlined_call_operand.vmem [shape: f32[4,2,64], index: 0, kind: input, shape index: {}]   ;;  %s71_s1 = inlined_call_operand.vmem [shape: f32[4,128], index: 1, kind: output, shape index: {}]  }
   0x1   :  { %v40_v0 = vld [vmem:[%s70_s0 + $0x6] sm:$0x3]  ;;  %v41_v1 = vld [vmem:[%s70_s0 + $0x4] sm:$0x3]  ;;  %v42_v2 = vld [vmem:[%s70_s0 + $0x2] sm:$0x3] }
   0x2   :  { %9 = vst [vmem:[#allocation1 + $0x18] sm:$0x3] %v40_v0  ;;  %14 = vst [vmem:[#allocation1 + $0x10] sm:$0x3] %v41_v1  ;;  %v19_v3 = vld [vmem:[%s70_s0] sm:$0x3] }
   0x3   :  { %18 = vst [vmem:[#allocation1 + $0x8] sm:$0x3] %v42_v2  ;;  %20 = vst [vmem:[#allocation1] sm:$0x3] %v19_v3  ;;  %s44_s0 = smov 64  }
   0xa   :  { %v25_v4 = vld [vmem:[#allocation1 + $0x1] ss:$8 sm:$0xf]   ;;  %v21_v5 = vld [vmem:[#allocation1] ss:$8 sm:$0xf]  }
   0xb   :  { %26 = vrot.lane.b32.xlu0 %v25_v4, %s44_s0  ;;  %23 = vst.msk [vmem:[#allocation0] sm:$0xf] %vm22_vm0, %v21_v5  }
  0x7d   :  { %v27_v6 = vpop.permute.xlu0 %26  }
  0x7e   :  { %29 = vst.msk [vmem:[#allocation0] sm:$0xf] %vm28_vm1, %v27_v6  }
  0x85   :  { %v34_v7 = vld [vmem:[#allocation0] sm:$0xf] }
  0x86   :  { %37 = vst [vmem:[%s71_s1] sm:$0xf] %v34_v7 }

// kernel: transformer_cell_forward.1
= control target key start
LH: loop header
LB: loop body
LE: loop exit
PB: predicated region body
PF: predicated region fallthrough
CT: control target
= control target key end

     0   :  { %vm64_vm0 = vcmask 1041408   ;;  %v1039_v0 = vmov 0.0   ;;  %vm1040_vm1 = vmmov 0   ;;  %vm60_vm2 = vcmask 31744   ;;  %s1044_s23 = smov 119   ;;  %s1046_s24 = smov 120   ;;  %s1309_s1 = inlined_call_operand.vmem [shape: bf16[1,3,4,128], index: 1, kind: input, shape index: {}]   ;;  %s1310_s0 = inlined_call_operand.vmem [shape: f32[1,4,128], index: 0, kind: input, shape index: {}]   ;;  %s1311_s5 = inlined_call_operand.vmem [shape: bf16[8,4], index: 5, kind: input, shape index: {}]   ;;  %s1312_s6 = inlined_call_operand.vmem [shape: f32[8,1], index: 6, kind: input, shape index: {}]   ;;  %s1313_s3 = inlined_call_operand.vmem [shape: bf16[8,4], index: 3, kind: input, shape index: {}]   ;;  %s1314_s4 = inlined_call_operand.vmem [shape: f32[8,1], index: 4, kind: input, shape index: {}]   ;;  %s1315_s8 = inlined_call_operand.vmem [shape: f32[8,1], index: 8, kind: input, shape index: {}]   ;;  %s1316_s2 = inlined_call_operand.vmem [shape: bf16[1,3,4,128], index: 2, kind: input, shape index: {}]   ;;  %s1317_s7 = inlined_call_operand.vmem [shape: bf16[8,4], index: 7, kind: input, shape index: {}]   ;;  %s1318_s9 = inlined_call_operand.vmem [shape: f32[8,24], index: 9, kind: input, shape index: {}]   ;;  %s1319_s11 = inlined_call_operand.vmem [shape: f32[4,1], index: 11, kind: input, shape index: {}]   ;;  %s1320_s12 = inlined_call_operand.vmem [shape: f32[9,128], index: 12, kind: input, shape index: {}]   ;;  %s1321_s10 = inlined_call_operand.vmem [shape: bf16[4,72], index: 10, kind: input, shape index: {}]   ;;  %s1322_s13 = inlined_call_operand.vmem [shape: f32[4,128], index: 13, kind: input, shape index: {}]   ;;  %s1323_s14 = inlined_call_operand.vmem [shape: f32[4,128], index: 14, kind: input, shape index: {}]   ;;  %s1324_s15 = inlined_call_operand.vmem [shape: f32[1,4,128], index: 15, kind: output, shape index: {}]  }
   0x1   :  { %932 = vmatprep.subr.bf16.mxu1 %v1039_v0  ;;  %v866_v1 = vld [vmem:[%s1309_s1 + $0x2] sm:$0x3]  ;;  %914 = vmatprep.subr.bf16.mxu0 %v1039_v0  ;;  %v870_v5 = vld [vmem:[%s1309_s1 + $0x4] sm:$0x3]  ;;  %v109_v7 = vld [vmem:[%s1309_s1] sm:$0x3] }
   0x2   :  { %v1139_v2 = vld [vmem:[%s1310_s0] sm:$0xf]  ;;  %v219_v3 = vsel %vm64_vm0, %v866_v1, 0  ;;  %934 = vmatprep.mubr.msk.bf16.mxu1 %vm1040_vm1, %v1039_v0  ;;  %916 = vmatprep.mubr.msk.bf16.mxu0 %vm1040_vm1, %v1039_v0  ;;  %v1041_v8 = vmov 0   ;;  %v309_v11 = vsel %vm64_vm0, %v870_v5, 0  ;;  %v120_v14 = vsel %vm64_vm0, %v109_v7, 0 }
   0x3   :  { %v53_v4 = vpack.c.bf16 %v1139_v2, %v1139_v2  ;;  %933 = vmatpush3.bf16.msra.mxu1 %v219_v3  ;;  %v108_v6 = vld [vmem:[%s1311_s5] sm:$0xf]  ;;  %1026 = vset.pattern.permute.xlu0 %v1041_v8  ;;  %v872_v21 = vld [vmem:[%s1316_s2 + $0x4] sm:$0x3]  ;;  %vm402_vm3 = vcmask 523264   ;;  %vm470_vm4 = vcmask 1043456  }
   0x4   :  { %v110_v9 = vld [vmem:[%s1312_s6] sm:$0xff]  ;;  %944 = vmatprep.subr.bf16.mxu1 %v1039_v0  ;;  %v354_v22 = vsel %vm64_vm0, %v872_v21, 0  ;;  %vm454_vm5 = vcmask 195584   ;;  %s1045_s0 = smov 127   ;;  %s1047_s25 = smov 1   ;;  %vm719_vm6 = vcmask 588800  }
   0x5   :  { %v66_v10 = vsel %vm64_vm0, %v53_v4, 0  ;;  %113 = vperm.xlu0 %1026, %v110_v9   ;;  %v52_v12 = vld [vmem:[%s1313_s3] sm:$0xf]  ;;  %s1048_s26 = smov 7   ;;  %s1049_s27 = smov 8  }
   0x6   :  { %915 = vmatpush3.bf16.msra.mxu0 %v66_v10  ;;  %v54_v13 = vld [vmem:[%s1314_s4] sm:$0xff]  ;;  %935 = vmatmul.mubr.msk.bf16.vlgmr.msra.gmra.mxu1 %vm60_vm2, %v108_v6  ;;  %s1050_s28 = smov 9  }
   0x7   :  { %920 = vmatprep.subr.bf16.mxu0 %v1039_v0  ;;  %945 = vmatpush3.bf16.msra.mxu1 %v309_v11  ;;  %v164_v15 = vld [vmem:[%s1315_s8] sm:$0xff] }
   0x8   :  { %946 = vmatprep.mubr.msk.bf16.mxu1 %vm1040_vm1, %v1039_v0  ;;  %956 = vmatprep.subr.bf16.mxu1 %v1039_v0  ;;  %v163_v16 = vld [vmem:[%s1316_s2] sm:$0x3]  ;;  %v868_v18 = vld [vmem:[%s1316_s2 + $0x2] sm:$0x3]  ;;  %s1042_s2 = smov 64  }
   0x9   :  { %917 = vmatmul.mubr.msk.bf16.vlgmr.msra.gmra.mxu0 %vm60_vm2, %v52_v12  ;;  %57 = vperm.xlu0 %1026, %v54_v13   ;;  %v174_v17 = vsel %vm64_vm0, %v163_v16, 0  ;;  %v162_v19 = vld [vmem:[%s1317_s7] sm:$0xf]  ;;  %v264_v20 = vsel %vm64_vm0, %v868_v18, 0 }
   0xa   :  { %921 = vmatpush3.bf16.msra.mxu0 %v120_v14  ;;  %922 = vmatprep.mubr.msk.bf16.mxu0 %vm1040_vm1, %v1039_v0  ;;  %v401_v8 = vld [vmem:[%s1318_s9] sm:$0xff]  ;;  %s1043_s9 = smov 121  }
   0xb   :  { %926 = vmatprep.subr.bf16.mxu0 %v1039_v0 }
   0xd   :  { %167 = vperm.xlu0 %1026, %v164_v15  }
   0xe   :  { %947 = vmatmul.mubr.msk.bf16.vlgmr.msra.gmra.mxu1 %vm60_vm2, %v108_v6 }
   0xf   :  { %960 = vmatprep.mubr.msk.bf16.mxu1 %vm1040_vm1, %v1039_v0 }
  0x11   :  { %923 = vmatmul.mubr.msk.bf16.vlgmr.msra.gmra.mxu0 %vm60_vm2, %v108_v6 }
  0x12   :  { %927 = vmatpush3.bf16.msra.mxu0 %v174_v17  ;;  %928 = vmatprep.mubr.msk.bf16.mxu0 %vm1040_vm1, %v1039_v0 }
  0x13   :  { %938 = vmatprep.subr.bf16.mxu0 %v1039_v0 }
  0x19   :  { %929 = vmatmul.mubr.msk.bf16.vlgmr.msra.gmra.mxu0 %vm60_vm2, %v162_v19 }
  0x1a   :  { %939 = vmatpush3.bf16.msra.mxu0 %v264_v20  ;;  %940 = vmatprep.mubr.msk.bf16.mxu0 %vm1040_vm1, %v1039_v0 }
  0x1b   :  { %950 = vmatprep.subr.bf16.mxu0 %v1039_v0 }
  0x21   :  { %941 = vmatmul.mubr.msk.bf16.vlgmr.msra.gmra.mxu0 %vm60_vm2, %v162_v19 }
  0x22   :  { %951 = vmatpush3.bf16.msra.mxu0 %v354_v22  ;;  %952 = vmatprep.mubr.msk.bf16.mxu0 %vm1040_vm1, %v1039_v0 }
  0x23   :  { %964 = vmatprep.subr.bf16.mxu0 %v1039_v0 }
  0x29   :  { %953 = vmatmul.mubr.msk.bf16.vlgmr.msra.gmra.mxu0 %vm60_vm2, %v162_v19 }
  0x2a   :  { %968 = vmatprep.mubr.msk.bf16.mxu0 %vm1040_vm1, %v1039_v0 }
  0x80   :  { %v114_v28 = vpop.permute.xlu0 %113 }
  0x84   :  { %v58_v37 = vpop.permute.xlu0 %57 }
  0x88   :  { %v168_v58 = vpop.permute.xlu0 %167 }
  0xc6   :  { %v255_v23 = vpop.f32.mrf.mxu1 }
  0xc7   :  { %v256_v36 = vadd.f32 %v255_v23, %v114_v28 }
  0xc8   :  { %v936_v25 = vpop.f32.mrf.mxu1 }
  0xc9   :  { %v102_v24 = vpop.f32.mrf.mxu0 }
  0xca   :  { %v258_v27 = vpop.f32.mrf.mxu1  ;;  %v103_v42 = vadd.f32 %v102_v24, %v58_v37 }
  0xcb   :  { %v918_v26 = vpop.f32.mrf.mxu0 }
  0xcc   :  { %v937_v30 = vpop.f32.mrf.mxu1  ;;  %v396_v48 = vpack.c.bf16 %v103_v42, %v103_v42 }
  0xcd   :  { %v105_v29 = vpop.f32.mrf.mxu0 }
  0xce   :  { %v345_v32 = vpop.f32.mrf.mxu1 }
  0xcf   :  { %v919_v31 = vpop.f32.mrf.mxu0  ;;  %v346_v33 = vadd.f32 %v345_v32, %v114_v28 }
  0xd0   :  { %v948_v35 = vpop.f32.mrf.mxu1 }
  0xd1   :  { %v156_v34 = vpop.f32.mrf.mxu0  ;;  %v398_v38 = vpack.c.bf16 %v346_v33, %v346_v33 }
  0xd2   :  { %v157_v39 = vadd.f32 %v156_v34, %v114_v28  ;;  %v348_v41 = vpop.f32.mrf.mxu1 }
  0xd3   :  { %v924_v40 = vpop.f32.mrf.mxu0  ;;  %v410_v43 = vsel %vm402_vm3, %v398_v38, 0 }
  0xd4   :  { %v397_v44 = vpack.c.bf16 %v256_v36, %v157_v39  ;;  %v949_v46 = vpop.f32.mrf.mxu1  ;;  %957 = vmatpush3.bf16.xpose.msra.mxu1 %v410_v43 }
  0xd5   :  { %v159_v45 = vpop.f32.mrf.mxu0  ;;  %958 = vmatprep.subr.bf16.mxu1 %v1039_v0 }
  0xd6   :  { %519 = vrot.lane.b32.xlu0 %v397_v44, %s1042_s2  ;;  %v407_v51 = vsel %vm402_vm3, %v397_v44, 0 }
  0xd7   :  { %v925_v47 = vpop.f32.mrf.mxu0 }
  0xd9   :  { %v210_v49 = vpop.f32.mrf.mxu0 }
  0xda   :  { %515 = vrot.lane.b32.xlu0 %v396_v48, %s1042_s2  ;;  %v211_v4 = vadd.f32 %v210_v49, %v168_v58 }
  0xdb   :  { %v930_v50 = vpop.f32.mrf.mxu0 }
  0xdc   :  { %959 = vmatpush3.bf16.xpose.msra.mxu1 %v407_v51 }
  0xdd   :  { %v213_v52 = vpop.f32.mrf.mxu0  ;;  %980 = vmatprep.subr.bf16.mxu1 %v1039_v0 }
  0xdf   :  { %v931_v53 = vpop.f32.mrf.mxu0 }
  0xe1   :  { %v300_v54 = vpop.f32.mrf.mxu0 }
  0xe2   :  { %v301_v63 = vadd.f32 %v300_v54, %v168_v58 }
  0xe3   :  { %v942_v55 = vpop.f32.mrf.mxu0  ;;  %961 = vmatmul.mubr.msk.bf16.vlgmr.msra.gmra.mxu1 %vm402_vm3, %v396_v48 }
  0xe4   :  { %984 = vmatprep.mubr.msk.bf16.mxu1 %vm1040_vm1, %v1039_v0  ;;  %v399_v6 = vpack.c.bf16 %v301_v63, %v211_v4  ;;  %v878_v63 = vld [vmem:[%s1320_s12 + $0x8] ss:$0 sm:$0xff] }
  0xe5   :  { %v303_v56 = vpop.f32.mrf.mxu0 }
  0xe7   :  { %v943_v57 = vpop.f32.mrf.mxu0 }
  0xe9   :  { %v390_v59 = vpop.f32.mrf.mxu0 }
  0xea   :  { %v391_v60 = vadd.f32 %v390_v59, %v168_v58  ;;  %v713_v58 = vld [vmem:[%s1319_s11] sm:$0xf]  ;;  %v648_v59 = vlaneseq }
  0xeb   :  { %v954_v61 = vpop.f32.mrf.mxu0 }
  0xec   :  { %v400_v62 = vpack.c.bf16 %v391_v60, %v391_v60  ;;  %v649_v60 = vshrl.u32 %v648_v59, 7 }
  0xed   :  { %v393_v1 = vpop.f32.mrf.mxu0 }
  0xee   :  { %v472_v3 = vsel %vm470_vm4, %v400_v62, 0  ;;  %v690_v61 = vsub.s32 6, %v649_v60  ;;  %v644_v1 = vld [vmem:[%s1320_s12] sm:$0xff] }
  0xef   :  { %965 = vmatpush3.bf16.msra.mxu0 %v472_v3  ;;  %v955_v5 = vpop.f32.mrf.mxu0 }
  0xf0   :  { %966 = vmatprep.subr.bf16.mxu0 %v1039_v0  ;;  %v683_v5 = vsub.s32 5, %v649_v60 }
  0xf3   :  { %967 = vmatpush3.bf16.msra.mxu0 %v399_v6 }
  0xf4   :  { %972 = vmatprep.subr.bf16.mxu0 %v1039_v0 }
 0x148   :  { %v520_v26 = vpop.permute.xlu0 %519 }
 0x149   :  { %v527_v27 = vsel %vm402_vm3, %v520_v26, 0 }
 0x14c   :  { %v516_v28 = vpop.permute.xlu0 %515 }
 0x1a3   :  { %v446_v7 = vpop.f32.mrf.mxu1 }
 0x1a4   :  { %v452_v9 = vmul.f32 0.125, %v446_v7 }
 0x1a5   :  { %v962_v10 = vpop.f32.mrf.mxu1 }
 0x1a6   :  { %v453_v11 = vadd.f32 %v452_v9, %v401_v8  ;;  %v676_v9 = vsub.s32 4, %v649_v60 }
 0x1a7   :  { %v449_v12 = vpop.f32.mrf.mxu1 }
 0x1a8   :  { %v455_v13 = vsel %vm454_vm5, %v453_v11, -inf }
 0x1a9   :  { %456 = vmax.xlane.f32.xlu1 %v455_v13  ;;  %v963_v14 = vpop.f32.mrf.mxu1 }
 0x1aa   :  { %v671_v14 = vsub.s32 3, %v649_v60 }
 0x232   :  { %v457_v15 = vpop.xlane.xlu1 %456 }
 0x233   :  { %v458_v16 = vsub.f32 %v453_v11, %v457_v15  ;;  %v684_v11 = vrot.slane %v644_v1, %v683_v5  ;;  %v664_v15 = vsub.s32 2, %v649_v60 }
 0x235   :  { %v459_v17 = vmul.f32 1.442695, %v458_v16 }
 0x237   :  { %1027 = vpow2.f32 %v459_v17 }
 0x244   :  { %v1028_v18 = vpop.eup %1027 }
 0x245   :  { %v461_v19 = vsel %vm454_vm5, %v1028_v18, 0.0 }
 0x246   :  { %462 = vadd.xlane.f32.xlu1 %v461_v19  ;;  %v677_v19 = vrot.slane %v644_v1, %v676_v9 }
 0x257   :  { %521 = vrot.lane.b32.xlu1 %v398_v38, %s1042_s2 }
 0x2cf   :  { %v463_v20 = vpop.xlane.xlu1 %462 }
 0x2d0   :  { %1029 = vrcp.f32 %v463_v20 }
 0x2d3   :  { %v522_v23 = vpop.permute.xlu1 %521 }
 0x2d4   :  { %v530_v25 = vsel %vm402_vm3, %v522_v23, 0  ;;  %v672_v23 = vrot.slane %v644_v1, %v671_v14 }
 0x2dd   :  { %v1030_v21 = vpop.eup %1029 }
 0x2de   :  { %v465_v22 = vmul.f32 %v1030_v21, %v1028_v18  ;;  %v657_v21 = vsub.s32 1, %v649_v60 }
 0x2e0   :  { %v466_v24 = vpack.c.bf16 %v465_v22, %v465_v22 }
 0x2e2   :  { %969 = vmatmul.mubr.msk.bf16.vlgmr.msra.gmra.mxu0 %vm454_vm5, %v466_v24 }
 0x2e3   :  { %973 = vmatpush3.bf16.xpose.msra.mxu0 %v530_v25  ;;  %976 = vmatprep.mubr.msk.bf16.mxu0 %vm1040_vm1, %v1039_v0  ;;  %v665_v25 = vrot.slane %v644_v1, %v664_v15 }
 0x2e4   :  { %974 = vmatprep.subr.bf16.mxu0 %v1039_v0 }
 0x2eb   :  { %975 = vmatpush3.bf16.xpose.msra.mxu0 %v527_v27  ;;  %v650_v27 = vsub.s32 0, %v649_v60 }
 0x2f2   :  { %977 = vmatmul.mubr.msk.bf16.vlgmr.msra.gmra.mxu0 %vm402_vm3, %v516_v28 }
 0x3a2   :  { %v508_v29 = vpop.f32.mrf.mxu0 }
 0x3a4   :  { %v970_v30 = vpop.f32.mrf.mxu0 }
 0x3a6   :  { %v511_v31 = vpop.f32.mrf.mxu0 }
 0x3a8   :  { %v971_v32 = vpop.f32.mrf.mxu0 }
 0x3b2   :  { %v566_v33 = vpop.f32.mrf.mxu0 }
 0x3b3   :  { %v572_v34 = vmul.f32 0.125, %v566_v33  ;;  %v651_v33 = vrot.slane %v644_v1, %v650_v27 }
 0x3b4   :  { %v978_v35 = vpop.f32.mrf.mxu0 }
 0x3b5   :  { %v573_v36 = vadd.f32 %v572_v34, %v401_v8 }
 0x3b6   :  { %v569_v37 = vpop.f32.mrf.mxu0 }
 0x3b7   :  { %v574_v38 = vsel %vm454_vm5, %v573_v36, -inf }
 0x3b8   :  { %575 = vmax.xlane.f32.xlu0 %v574_v38  ;;  %v979_v39 = vpop.f32.mrf.mxu0 }
 0x3ce   :  { %590 = vrot.lane.b32.xlu0 %v400_v62, %s1042_s2  ;;  %v697_v62 = vsub.s32 7, %v649_v60 }
 0x3d0   :  { %v698_v8 = vrot.slane %v644_v1, %v697_v62 }
 0x441   :  { %v576_v40 = vpop.xlane.xlu0 %575 }
 0x442   :  { %v577_v41 = vsub.f32 %v573_v36, %v576_v40  ;;  %v712_v40 = vld [vmem:[%s1321_s10] sm:$0x3] }
 0x444   :  { %v578_v42 = vmul.f32 1.442695, %v577_v41  ;;  %v769_v41 = vand.u32 127, %v648_v59 }
 0x445   :  { %v591_v43 = vpop.permute.xlu0 %590 }
 0x446   :  { %1031 = vpow2.f32 %v578_v42  ;;  %v597_v44 = vsel %vm470_vm4, %v591_v43, 0  ;;  %vm771_vm7 = vcmp.lt.s32.totalorder %v769_v41, 64  ;;  %vm811_vm8 = vcmp.ge.s32.totalorder %v769_v41, 64  ;;  %v856_v41 = vld [vmem:[%s1323_s14] sm:$0xf] }
 0x447   :  { %981 = vmatpush3.bf16.msra.mxu1 %v597_v44 }
 0x448   :  { %982 = vmatprep.subr.bf16.mxu1 %v1039_v0 }
 0x453   :  { %v1032_v45 = vpop.eup %1031 }
 0x454   :  { %v580_v46 = vsel %vm454_vm5, %v1032_v45, 0.0 }
 0x455   :  { %581 = vadd.xlane.f32.xlu1 %v580_v46  ;;  %v1270_v46 = vsel %vm771_vm7, 1.0, %v1039_v0 }
 0x466   :  { %588 = vrot.lane.b32.xlu1 %v399_v6, %s1042_s2  ;;  %v691_v6 = vrot.slane %v644_v1, %v690_v61 }
 0x4de   :  { %v582_v47 = vpop.xlane.xlu1 %581 }
 0x4df   :  { %1033 = vrcp.f32 %v582_v47 }
 0x4e2   :  { %v589_v48 = vpop.permute.xlu1 %588 }
 0x4e3   :  { %983 = vmatpush3.bf16.msra.mxu1 %v589_v48 }
 0x4e4   :  { %988 = vmatprep.subr.bf16.mxu1 %v1039_v0 }
 0x4ec   :  { %v1034_v49 = vpop.eup %1033 }
 0x4ed   :  { %v584_v50 = vmul.f32 %v1034_v49, %v1032_v45 }
 0x4ef   :  { %v585_v51 = vpack.c.bf16 %v584_v50, %v584_v50 }
 0x4f1   :  { %985 = vmatmul.mubr.msk.bf16.vlgmr.msra.gmra.mxu1 %vm454_vm5, %v585_v51 }
 0x4f2   :  { %998 = vmatprep.mubr.msk.bf16.mxu1 %vm1040_vm1, %v1039_v0 }
 0x5b1   :  { %v633_v52 = vpop.f32.mrf.mxu1 }
 0x5b2   :  { %640 = vrot.lane.b32.xlu0 %v633_v52, %s1042_s2  ;;  %v1280_v52 = vsel %vm811_vm8, 1.0, %v1039_v0 }
 0x5b3   :  { %v986_v53 = vpop.f32.mrf.mxu1 }
 0x5b5   :  { %v636_v54 = vpop.f32.mrf.mxu1 }
 0x5b7   :  { %v987_v55 = vpop.f32.mrf.mxu1 }
 0x624   :  { %v641_v56 = vpop.permute.xlu0 %640 }
 0x625   :  { %v643_v57 = vsel %vm402_vm3, %v508_v29, %v641_v56  ;;  %v658_v29 = vrot.slane %v644_v1, %v657_v21 }
 0x626   :  { %686 = vrot.lane.b32.xlu1 %v643_v57, %s1043_s9  ;;  %700 = vrot.lane.b32.xlu0 %v643_v57, %s1044_s23  ;;  %v678_v28 = vmul.f32 %v677_v19, %v643_v57 }
 0x62a   :  { %679 = vrot.lane.b32.xlu1 %v643_v57, %s1045_s0  ;;  %693 = vrot.lane.b32.xlu0 %v643_v57, %s1046_s24 }
 0x62e   :  { %667 = vrot.lane.b32.xlu1 %v643_v57, %s1047_s25  ;;  %660 = vrot.lane.b32.xlu0 %v643_v57, %s1048_s26 }
 0x632   :  { %653 = vrot.lane.b32.xlu1 %v643_v57, %s1049_s27  ;;  %646 = vrot.lane.b32.xlu0 %v643_v57, %s1050_s28 }
 0x636   :  { %716 = vperm.xlu0 %1026, %v713_v58  }
 0x698   :  { %v687_v3 = vpop.permute.xlu1 %686  ;;  %v701_v4 = vpop.permute.xlu0 %700 }
 0x699   :  { %v706_v7 = vmul.f32 %v878_v63, %v701_v4  ;;  %v692_v16 = vmul.f32 %v691_v6, %v687_v3 }
 0x69b   :  { %v711_v10 = vpack.c.bf16 %v706_v7, %v706_v7 }
 0x69c   :  { %v680_v12 = vpop.permute.xlu1 %679  ;;  %v694_v13 = vpop.permute.xlu0 %693 }
 0x69d   :  { %v724_v17 = vsel %vm470_vm4, %v711_v10, 0  ;;  %v699_v18 = vmul.f32 %v698_v8, %v694_v13  ;;  %v685_v22 = vmul.f32 %v684_v11, %v680_v12 }
 0x69e   :  { %989 = vmatpush3.bf16.msra.mxu1 %v724_v17 }
 0x69f   :  { %v710_v20 = vpack.c.bf16 %v699_v18, %v692_v16  ;;  %990 = vmatprep.subr.bf16.mxu1 %v1039_v0  ;;  %v709_v30 = vpack.c.bf16 %v685_v22, %v678_v28 }
 0x6a0   :  { %v668_v24 = vpop.permute.xlu1 %667  ;;  %v661_v26 = vpop.permute.xlu0 %660 }
 0x6a1   :  { %v673_v31 = vmul.f32 %v672_v23, %v668_v24  ;;  %v666_v32 = vmul.f32 %v665_v25, %v661_v26 }
 0x6a2   :  { %991 = vmatpush3.bf16.msra.mxu1 %v710_v20 }
 0x6a3   :  { %992 = vmatprep.subr.bf16.mxu1 %v1039_v0  ;;  %v708_v36 = vpack.c.bf16 %v673_v31, %v666_v32 }
 0x6a4   :  { %v654_v34 = vpop.permute.xlu1 %653  ;;  %v647_v35 = vpop.permute.xlu0 %646 }
 0x6a5   :  { %v659_v37 = vmul.f32 %v658_v29, %v654_v34  ;;  %v652_v38 = vmul.f32 %v651_v33, %v647_v35 }
 0x6a6   :  { %993 = vmatpush3.bf16.msra.mxu1 %v709_v30 }
 0x6a7   :  { %994 = vmatprep.subr.bf16.mxu1 %v1039_v0  ;;  %v707_v39 = vpack.c.bf16 %v659_v37, %v652_v38 }
 0x6aa   :  { %995 = vmatpush3.bf16.msra.mxu1 %v708_v36 }
 0x6ab   :  { %996 = vmatprep.subr.bf16.mxu1 %v1039_v0 }
 0x6ae   :  { %997 = vmatpush3.bf16.msra.mxu1 %v707_v39  ;;  %v854_v39 = vld [vmem:[%s1322_s13] sm:$0xf] }
 0x6b1   :  { %999 = vmatmul.mubr.msk.bf16.vlgmr.msra.gmra.mxu1 %vm719_vm6, %v712_v40  ;;  %v717_v42 = vpop.permute.xlu0 %716 }
 0x771   :  { %v760_v43 = vpop.f32.mrf.mxu1 }
 0x772   :  { %v761_v44 = vadd.f32 %v760_v43, %v717_v42 }
 0x773   :  { %v1000_v45 = vpop.f32.mrf.mxu1 }
 0x774   :  { %v1273_v47 = vadd.f32 %v761_v44, %v1139_v2 }
 0x775   :  { %v763_v48 = vpop.f32.mrf.mxu1 }
 0x776   :  { %v775_v49 = vmul.f32 %v1270_v46, %v1273_v47  ;;  %v767_v50 = vmul.f32 %v1273_v47, %v1273_v47  ;;  %v816_v56 = vmul.f32 %v1280_v52, %v1273_v47 }
 0x777   :  { %v1001_v51 = vpop.f32.mrf.mxu1 }
 0x778   :  { %v776_v53 = vsel %vm470_vm4, %v775_v49, 0.0  ;;  %v787_v54 = vmul.f32 %v1270_v46, %v767_v50  ;;  %v828_v55 = vmul.f32 %v1280_v52, %v767_v50  ;;  %v817_v58 = vsel %vm470_vm4, %v816_v56, 0.0 }
 0x779   :  { %777 = vadd.xlane.f32.xlu1 %v776_v53 }
 0x77a   :  { %v788_v2 = vsel %vm470_vm4, %v787_v54, 0.0  ;;  %v829_v57 = vsel %vm470_vm4, %v828_v55, 0.0 }
 0x77b   :  { %789 = vadd.xlane.f32.xlu0 %v788_v2 }
 0x77d   :  { %830 = vadd.xlane.f32.xlu1 %v829_v57 }
 0x77f   :  { %818 = vadd.xlane.f32.xlu0 %v817_v58 }
 0x802   :  { %v778_v0 = vpop.xlane.xlu1 %777 }
 0x803   :  { %v779_v59 = vrot.slane %v778_v0, 4 }
 0x804   :  { %v790_v60 = vpop.xlane.xlu0 %789 }
 0x805   :  { %v780_v61 = vadd.f32 %v779_v59, %v778_v0  ;;  %v791_v62 = vrot.slane %v790_v60, 4 }
 0x806   :  { %v831_v11 = vpop.xlane.xlu1 %830 }
 0x807   :  { %v781_v63 = vrot.slane %v780_v61, 2  ;;  %v792_v1 = vadd.f32 %v791_v62, %v790_v60  ;;  %v832_v13 = vrot.slane %v831_v11, 4 }
 0x808   :  { %v819_v10 = vpop.xlane.xlu0 %818 }
 0x809   :  { %v793_v3 = vrot.slane %v792_v1, 2  ;;  %v782_v4 = vadd.f32 %v781_v63, %v780_v61  ;;  %v820_v12 = vrot.slane %v819_v10, 4  ;;  %v833_v15 = vadd.f32 %v832_v13, %v831_v11 }
 0x80b   :  { %v783_v5 = vrot.slane %v782_v4, 1  ;;  %v794_v6 = vadd.f32 %v793_v3, %v792_v1  ;;  %v821_v14 = vadd.f32 %v820_v12, %v819_v10  ;;  %v834_v18 = vrot.slane %v833_v15, 2 }
 0x80d   :  { %v784_v7 = vadd.f32 %v783_v5, %v782_v4  ;;  %v795_v8 = vrot.slane %v794_v6, 1  ;;  %v822_v17 = vrot.slane %v821_v14, 2  ;;  %v835_v20 = vadd.f32 %v834_v18, %v833_v15 }
 0x80f   :  { %1002 = vpush %v784_v7  ;;  %v796_v9 = vadd.f32 %v795_v8, %v794_v6  ;;  %v823_v19 = vadd.f32 %v822_v17, %v821_v14  ;;  %v836_v22 = vrot.slane %v835_v20, 1 }
 0x811   :  { %1004 = vpush %v796_v9  ;;  %v824_v21 = vrot.slane %v823_v19, 1  ;;  %v837_v25 = vadd.f32 %v836_v22, %v835_v20 }
 0x813   :  { %v825_v24 = vadd.f32 %v824_v21, %v823_v19 }
 0x840   :  { %s1003_s10 = spop %1002 }
 0x841   :  { %s1290_s4 = smul.f32 0.00390625, %s1003_s10 }
 0x842   :  { %s1005_s16 = spop %1004 }
 0x843   :  { %s799_s8 = smul.f32 %s1290_s4, %s1290_s4  ;;  %v805_v26 = vstv %s1290_s4 }
 0x844   :  { %s798_s17 = smul.f32 0.00390625, %s1005_s16  ;;  %v806_v28 = vmul.f32 %v1270_v46, %v805_v26 }
 0x846   :  { %s800_s18 = ssub.f32 %s798_s17, %s799_s8 }
 0x848   :  { %s801_s19 = sadd.f32 1e-05, %s800_s18 }
 0x84a   :  { %v802_v16 = vstv %s801_s19 }
 0x84b   :  { %1035 = vrsqrt.f32 %v802_v16 }
 0x858   :  { %v1036_v23 = vpop.eup %1035 }
 0x859   :  { %1006 = vpush %v1036_v23 }
 0x85a   :  { %1008 = vpush %v825_v24 }
 0x85b   :  { %1010 = vpush %v837_v25 }
 0x88a   :  { %s1007_s20 = spop %1006 }
 0x88b   :  { %s1009_s21 = spop %1008  ;;  %v808_v33 = vstv %s1007_s20 }
 0x88c   :  { %s827_s2 = smul.f32 0.00390625, %s1009_s21  ;;  %s1011_s7 = spop %1010  ;;  %v809_v35 = vmul.f32 %v1270_v46, %v808_v33 }
 0x88d   :  { %s839_s22 = smul.f32 0.00390625, %s1011_s7 }
 0x88e   :  { %s840_s9 = smul.f32 %s827_s2, %s827_s2  ;;  %v846_v27 = vstv %s827_s2 }
 0x88f   :  { %v847_v29 = vmul.f32 %v1280_v52, %v846_v27 }
 0x890   :  { %s841_s23 = ssub.f32 %s839_s22, %s840_s9 }
 0x891   :  { %v848_v30 = vadd.f32 %v847_v29, %v806_v28 }
 0x892   :  { %s842_s0 = sadd.f32 1e-05, %s841_s23 }
 0x893   :  { %v852_v38 = vsub.f32 %v1273_v47, %v848_v30 }
 0x894   :  { %v843_v31 = vstv %s842_s0 }
 0x895   :  { %1037 = vrsqrt.f32 %v843_v31 }
 0x8a2   :  { %v1038_v32 = vpop.eup %1037 }
 0x8a3   :  { %1012 = vpush %v1038_v32 }
 0x8d4   :  { %s1013_s24 = spop %1012 }
 0x8d5   :  { %v849_v34 = vstv %s1013_s24 }
 0x8d6   :  { %v850_v36 = vmul.f32 %v1280_v52, %v849_v34 }
 0x8d8   :  { %v851_v37 = vadd.f32 %v850_v36, %v809_v35 }
 0x8da   :  { %v853_v40 = vmul.f32 %v852_v38, %v851_v37 }
 0x8dc   :  { %v855_v42 = vmul.f32 %v854_v39, %v853_v40 }
 0x8de   :  { %v857_v43 = vadd.f32 %v856_v41, %v855_v42 }
 0x8e0   :  { %858 = vst [vmem:[%s1324_s15] sm:$0xf] %v857_v43 }

</bundles_post_ra>
